<compile_context>
chip_gen: v7x
topology: tpu7x:2x2x1
jax: 0.10.0
libtpu: 0.0.40
codegen_flags: <defaults>
</compile_context>

<pallas_src>
import jax
import jax.numpy as jnp
from jax.experimental import pallas as pl
from jax.experimental.pallas import tpu as pltpu


def _conv1x1_silu_kernel(x_ref, w_ref, b_ref, o_ref):
    # x_ref: (C_in, R, 128) in VMEM (lane-dense, full sublane occupancy)
    # w_ref: (C_out*C_in,) in SMEM; b_ref: (C_out,) in SMEM
    # o_ref: (C_out, R, 128) in VMEM
    c_in = x_ref.shape[0]
    c_out = o_ref.shape[0]

    x = x_ref[...].astype(jnp.float32)  # (C_in, R, 128)

    accs = []
    for co in range(c_out):
        # 1x1 conv for one output channel, bias folded into the init:
        #   acc = b[co] + sum_ci w[co, ci] * x[ci]
        acc = x[0] * w_ref[co * c_in + 0] + b_ref[co]
        for ci in range(1, c_in):
            acc = acc + x[ci] * w_ref[co * c_in + ci]
        accs.append(acc)

    t1 = jnp.stack(accs, axis=0)  # (C_out, R, 128) f32
    # torch.mul(Sigmoid()(t1), t1) == SiLU; single full-block unmasked store.
    o_ref[...] = (jax.nn.sigmoid(t1) * t1).astype(o_ref.dtype)


def conv1x1_silu(x, weight, bias, *, pixel_splits=2):
    """x: (N, C_in, H, W) NCHW; weight: (C_out, C_in, 1, 1); bias: (C_out,)."""
    N, C_in, H, W = x.shape
    C_out = weight.shape[0]
    HW = H * W
    assert HW % 128 == 0, "H*W must be a multiple of 128 for this layout"
    R = HW // 128  # sublane-axis rows per sample

    # Shard the pixel axis across grid steps (megacore on v7x); keep each
    # block's sublane extent a multiple of 8.
    P = max(1, int(pixel_splits))
    while P > 1 and (R % P != 0 or (R // P) % 8 != 0):
        P -= 1
    Rb = R // P

    xm = x.reshape(N, C_in, R, 128)        # free reshape (contiguous split)
    wm = weight.reshape(C_out * C_in)      # 1D scalars -> SMEM
    bm = bias.reshape(C_out)               # 1D scalars -> SMEM

    out_flat = pl.pallas_call(
        _conv1x1_silu_kernel,
        out_shape=jax.ShapeDtypeStruct((N, C_out, R, 128), x.dtype),
        grid_spec=pltpu.PrefetchScalarGridSpec(
            num_scalar_prefetch=0,
            grid=(N, P),
            in_specs=[
                # batch dim squeezed out; kernel sees (C_in, Rb, 128)
                pl.BlockSpec((None, C_in, Rb, 128), lambda n, p: (n, 0, p, 0)),
                pl.BlockSpec(memory_space=pltpu.MemorySpace.SMEM),
                pl.BlockSpec(memory_space=pltpu.MemorySpace.SMEM),
            ],
            out_specs=pl.BlockSpec((None, C_out, Rb, 128),
                                   lambda n, p: (n, 0, p, 0)),
        ),
        compiler_params=pltpu.CompilerParams(
            dimension_semantics=("parallel", "parallel"),
        ),
    )(xm, wm, bm)

    return out_flat.reshape(N, C_out, H, W)  # free reshape back to NCHW


if __name__ == "__main__":
    key = jax.random.PRNGKey(0)
    k_x, k_w, k_b = jax.random.split(key, 3)

    # Same shape as the PyTorch reference: torch.rand(1, 3, 64, 64)
    x = jax.random.uniform(k_x, (1, 3, 64, 64), dtype=jnp.float32)

    # Deterministic Conv2d(3, 3, 1) parameters (kaiming-uniform-like range).
    fan_in = 3 * 1 * 1
    bound = 1.0 / (fan_in ** 0.5)
    weight = jax.random.uniform(k_w, (3, 3, 1, 1), minval=-bound, maxval=bound,
                                dtype=jnp.float32)
    bias = jax.random.uniform(k_b, (3,), minval=-bound, maxval=bound,
                              dtype=jnp.float32)

    out = conv1x1_silu(x, weight, bias)
    out = jax.block_until_ready(out)

    # Pure-JAX reference check (conv1x1 == per-pixel channel matmul + bias).
    t1 = jnp.einsum("nchw,oc->nohw", x, weight.reshape(3, 3)) \
        + bias.reshape(1, 3, 1, 1)
    ref = jax.nn.sigmoid(t1) * t1
    assert out.shape == (1, 3, 64, 64)
    assert jnp.allclose(out, ref, atol=1e-5, rtol=1e-5)

    print("KERNEL_OK")
</pallas_src>

<mosaic_0001>
module attributes {stable_mosaic.version = 11 : i64} {
  func.func @_conv1x1_silu_kernel(%arg0: i32, %arg1: i32, %arg2: memref<1x3x16x128xf32, #tpu.memory_space<vmem>>, %arg3: memref<9xf32, #tpu.memory_space<smem>>, %arg4: memref<3xf32, #tpu.memory_space<smem>>, %arg5: memref<1x3x16x128xf32, #tpu.memory_space<vmem>>) attributes {dimension_semantics = [#tpu.dimension_semantics<parallel>, #tpu.dimension_semantics<parallel>], iteration_bounds = array<i64: 1, 2>, scalar_prefetch = 0 : i64, scratch_operands = 0 : i64, tpu.core_type = #tpu.core_type<tc>, window_params = [{transform_indices = @transform_0, window_bounds = array<i64: 1, 3, 16, 128>}, {transform_indices = @transform_1, window_bounds = array<i64: 9>}, {transform_indices = @transform_2, window_bounds = array<i64: 3>}, {transform_indices = @transform_3, window_bounds = array<i64: 1, 3, 16, 128>}]} {
    %c0 = arith.constant 0 : index
    %c0_0 = arith.constant 0 : index
    %c0_1 = arith.constant 0 : index
    %c0_2 = arith.constant 0 : index
    %0 = vector.load %arg2[%c0, %c0_0, %c0_1, %c0_2] : memref<1x3x16x128xf32, #tpu.memory_space<vmem>>, vector<1x3x16x128xf32>
    %1 = vector.shape_cast %0 : vector<1x3x16x128xf32> to vector<3x16x128xf32>
    %2 = vector.extract_strided_slice %1 {offsets = [0, 0, 0], sizes = [1, 16, 128], strides = [1, 1, 1]} : vector<3x16x128xf32> to vector<1x16x128xf32>
    %3 = vector.shape_cast %2 : vector<1x16x128xf32> to vector<16x128xf32>
    %c0_3 = arith.constant 0 : index
    %4 = memref.load %arg3[%c0_3] : memref<9xf32, #tpu.memory_space<smem>>
    %5 = vector.broadcast %4 : f32 to vector<16x128xf32>
    %6 = arith.mulf %3, %5 : vector<16x128xf32>
    %c0_4 = arith.constant 0 : index
    %7 = memref.load %arg4[%c0_4] : memref<3xf32, #tpu.memory_space<smem>>
    %8 = vector.broadcast %7 : f32 to vector<16x128xf32>
    %9 = arith.addf %6, %8 : vector<16x128xf32>
    %10 = vector.extract_strided_slice %1 {offsets = [1, 0, 0], sizes = [1, 16, 128], strides = [1, 1, 1]} : vector<3x16x128xf32> to vector<1x16x128xf32>
    %11 = vector.shape_cast %10 : vector<1x16x128xf32> to vector<16x128xf32>
    %c1 = arith.constant 1 : index
    %12 = memref.load %arg3[%c1] : memref<9xf32, #tpu.memory_space<smem>>
    %13 = vector.broadcast %12 : f32 to vector<16x128xf32>
    %14 = arith.mulf %11, %13 : vector<16x128xf32>
    %15 = arith.addf %9, %14 : vector<16x128xf32>
    %16 = vector.extract_strided_slice %1 {offsets = [2, 0, 0], sizes = [1, 16, 128], strides = [1, 1, 1]} : vector<3x16x128xf32> to vector<1x16x128xf32>
    %17 = vector.shape_cast %16 : vector<1x16x128xf32> to vector<16x128xf32>
    %c2 = arith.constant 2 : index
    %18 = memref.load %arg3[%c2] : memref<9xf32, #tpu.memory_space<smem>>
    %19 = vector.broadcast %18 : f32 to vector<16x128xf32>
    %20 = arith.mulf %17, %19 : vector<16x128xf32>
    %21 = arith.addf %15, %20 : vector<16x128xf32>
    %22 = vector.extract_strided_slice %1 {offsets = [0, 0, 0], sizes = [1, 16, 128], strides = [1, 1, 1]} : vector<3x16x128xf32> to vector<1x16x128xf32>
    %23 = vector.shape_cast %22 : vector<1x16x128xf32> to vector<16x128xf32>
    %c3 = arith.constant 3 : index
    %24 = memref.load %arg3[%c3] : memref<9xf32, #tpu.memory_space<smem>>
    %25 = vector.broadcast %24 : f32 to vector<16x128xf32>
    %26 = arith.mulf %23, %25 : vector<16x128xf32>
    %c1_5 = arith.constant 1 : index
    %27 = memref.load %arg4[%c1_5] : memref<3xf32, #tpu.memory_space<smem>>
    %28 = vector.broadcast %27 : f32 to vector<16x128xf32>
    %29 = arith.addf %26, %28 : vector<16x128xf32>
    %30 = vector.extract_strided_slice %1 {offsets = [1, 0, 0], sizes = [1, 16, 128], strides = [1, 1, 1]} : vector<3x16x128xf32> to vector<1x16x128xf32>
    %31 = vector.shape_cast %30 : vector<1x16x128xf32> to vector<16x128xf32>
    %c4 = arith.constant 4 : index
    %32 = memref.load %arg3[%c4] : memref<9xf32, #tpu.memory_space<smem>>
    %33 = vector.broadcast %32 : f32 to vector<16x128xf32>
    %34 = arith.mulf %31, %33 : vector<16x128xf32>
    %35 = arith.addf %29, %34 : vector<16x128xf32>
    %36 = vector.extract_strided_slice %1 {offsets = [2, 0, 0], sizes = [1, 16, 128], strides = [1, 1, 1]} : vector<3x16x128xf32> to vector<1x16x128xf32>
    %37 = vector.shape_cast %36 : vector<1x16x128xf32> to vector<16x128xf32>
    %c5 = arith.constant 5 : index
    %38 = memref.load %arg3[%c5] : memref<9xf32, #tpu.memory_space<smem>>
    %39 = vector.broadcast %38 : f32 to vector<16x128xf32>
    %40 = arith.mulf %37, %39 : vector<16x128xf32>
    %41 = arith.addf %35, %40 : vector<16x128xf32>
    %42 = vector.extract_strided_slice %1 {offsets = [0, 0, 0], sizes = [1, 16, 128], strides = [1, 1, 1]} : vector<3x16x128xf32> to vector<1x16x128xf32>
    %43 = vector.shape_cast %42 : vector<1x16x128xf32> to vector<16x128xf32>
    %c6 = arith.constant 6 : index
    %44 = memref.load %arg3[%c6] : memref<9xf32, #tpu.memory_space<smem>>
    %45 = vector.broadcast %44 : f32 to vector<16x128xf32>
    %46 = arith.mulf %43, %45 : vector<16x128xf32>
    %c2_6 = arith.constant 2 : index
    %47 = memref.load %arg4[%c2_6] : memref<3xf32, #tpu.memory_space<smem>>
    %48 = vector.broadcast %47 : f32 to vector<16x128xf32>
    %49 = arith.addf %46, %48 : vector<16x128xf32>
    %50 = vector.extract_strided_slice %1 {offsets = [1, 0, 0], sizes = [1, 16, 128], strides = [1, 1, 1]} : vector<3x16x128xf32> to vector<1x16x128xf32>
    %51 = vector.shape_cast %50 : vector<1x16x128xf32> to vector<16x128xf32>
    %c7 = arith.constant 7 : index
    %52 = memref.load %arg3[%c7] : memref<9xf32, #tpu.memory_space<smem>>
    %53 = vector.broadcast %52 : f32 to vector<16x128xf32>
    %54 = arith.mulf %51, %53 : vector<16x128xf32>
    %55 = arith.addf %49, %54 : vector<16x128xf32>
    %56 = vector.extract_strided_slice %1 {offsets = [2, 0, 0], sizes = [1, 16, 128], strides = [1, 1, 1]} : vector<3x16x128xf32> to vector<1x16x128xf32>
    %57 = vector.shape_cast %56 : vector<1x16x128xf32> to vector<16x128xf32>
    %c8 = arith.constant 8 : index
    %58 = memref.load %arg3[%c8] : memref<9xf32, #tpu.memory_space<smem>>
    %59 = vector.broadcast %58 : f32 to vector<16x128xf32>
    %60 = arith.mulf %57, %59 : vector<16x128xf32>
    %61 = arith.addf %55, %60 : vector<16x128xf32>
    %62 = vector.shape_cast %21 : vector<16x128xf32> to vector<1x16x128xf32>
    %63 = vector.shape_cast %41 : vector<16x128xf32> to vector<1x16x128xf32>
    %64 = vector.shape_cast %61 : vector<16x128xf32> to vector<1x16x128xf32>
    %65 = tpu.concatenate %62, %63, %64 in 0 : vector<1x16x128xf32>, vector<1x16x128xf32>, vector<1x16x128xf32> -> vector<3x16x128xf32>
    %66 = arith.negf %65 : vector<3x16x128xf32>
    %67 = math.exp %66 : vector<3x16x128xf32>
    %cst = arith.constant 1.000000e+00 : f32
    %68 = vector.broadcast %cst : f32 to vector<3x16x128xf32>
    %69 = arith.addf %68, %67 : vector<3x16x128xf32>
    %70 = arith.divf %68, %69 : vector<3x16x128xf32>
    %71 = arith.mulf %70, %65 : vector<3x16x128xf32>
    %c0_7 = arith.constant 0 : index
    %c0_8 = arith.constant 0 : index
    %c0_9 = arith.constant 0 : index
    %c0_10 = arith.constant 0 : index
    %72 = vector.load %arg5[%c0_7, %c0_8, %c0_9, %c0_10] : memref<1x3x16x128xf32, #tpu.memory_space<vmem>>, vector<1x3x16x128xf32>
    %73 = vector.shape_cast %72 : vector<1x3x16x128xf32> to vector<3x16x128xf32>
    %74 = vector.shape_cast %71 : vector<3x16x128xf32> to vector<1x3x16x128xf32>
    tpu.vector_store %arg5[%c0_7, %c0_8, %c0_9, %c0_10], %74 {strides = array<i32>} : memref<1x3x16x128xf32, #tpu.memory_space<vmem>>, vector<1x3x16x128xf32>,
    return
  }
  func.func @transform_0(%arg0: i32, %arg1: i32) -> (i32, i32, i32, i32) {
    %c0_i32 = arith.constant 0 : i32
    %c0_i32_0 = arith.constant 0 : i32
    %c0_i32_1 = arith.constant 0 : i32
    return %arg0, %c0_i32, %arg1, %c0_i32_0 : i32, i32, i32, i32
  }
  func.func @transform_1(%arg0: i32, %arg1: i32) -> i32 {
    %c0_i32 = arith.constant 0 : i32
    %c0_i32_0 = arith.constant 0 : i32
    return %c0_i32 : i32
  }
  func.func @transform_2(%arg0: i32, %arg1: i32) -> i32 {
    %c0_i32 = arith.constant 0 : i32
    %c0_i32_0 = arith.constant 0 : i32
    return %c0_i32 : i32
  }
  func.func @transform_3(%arg0: i32, %arg1: i32) -> (i32, i32, i32, i32) {
    %c0_i32 = arith.constant 0 : i32
    %c0_i32_0 = arith.constant 0 : i32
    %c0_i32_1 = arith.constant 0 : i32
    return %arg0, %c0_i32, %arg1, %c0_i32_0 : i32, i32, i32, i32
  }
}

</mosaic_0001>

<bundles_post_ra>
// kernel: tpu_custom_call.1
= control target key start
LH: loop header
LB: loop body
LE: loop exit
PB: predicated region body
PF: predicated region fallthrough
CT: control target
= control target key end

     0   :  { %s1030_s0 = inlined_call_operand.hbm [shape: f32[1,3,32,128], index: 0, kind: input, shape index: {}]   ;;  %s1031_s1 = inlined_call_operand.vmem [shape: f32[9], index: 1, kind: input, shape index: {}]   ;;  %s1032_s2 = inlined_call_operand.vmem [shape: f32[3], index: 2, kind: input, shape index: {}]   ;;  %s1033_s3 = inlined_call_operand.hbm [shape: f32[1,3,32,128], index: 3, kind: output, shape index: {}]  }
   0x1   :  { %1040 = sst [smem:[#allocation19_spill]] %s1031_s1 }
   0x2   :  { %8 = vsyncpa [#allocation3], 0 }
   0x3   :  { %10 = vsyncpa [#allocation3 + $0x1], 0 }
   0x4   :  { %11 = vsyncpa [#allocation5], 0 }
   0x5   :  { %12 = vsyncpa [#allocation8], 0 }
   0x6   :  { %13 = vsyncpa [#allocation4], 0 }
   0x7   :  { %15 = vsyncpa [#allocation4 + $0x1], 0  ;;  %s823_s12 = smov 0   ;;  %s825_s13 = smov 0  }
   0x8   :  { %s827_s14 = smov 0   ;;  %s829_s15 = smov 0  }
   0x9   :  { %s831_s16 = smov 0   ;;  %s833_s17 = smov 0  }
   0xa LB: > { %s529_s18 = sadd.s32 4294967295, %s786_s17   ;;  %s530_s19 = sadd.s32 4294967294, %s786_s17   ;;  %s786_s17 = sphi %s833_s17, %s21_s17   ;;  %s782_s16 = sphi %s831_s16, %s1059_s16   ;;  %s778_s15 = sphi %s829_s15, %s1058_s15   ;;  %s774_s14 = sphi %s827_s14, %s1057_s14   ;;  %s770_s13 = sphi %s825_s13, %s1056_s13   ;;  %s766_s12 = sphi %s823_s12, %s1055_s12  }
   0xb   : > { %s30_s20 = sadd.s32 1, %s782_s16  ;;  %s42_s21 = sadd.s32 1, %s774_s14 }
   0xc   : > { %p31_p0 = scmp.ge.s32.totalorder %s30_s20, 2  ;;  %p49_p1 = scmp.ne.s32.totalorder %s774_s14, %s770_s13 }
   0xd   : > { %p50_p2 = scmp.eq.s32.totalorder %s786_s17, 0  ;;  %p55_p3 = scmp.ne.s32.totalorder %s770_s13, %s766_s12 }
   0xe   : > { %s1061_s20 = smov (%p31_p0, %s30_s20), 0  ;;  %p868_p5 = scmp.eq.s32.totalorder %s529_s18, 0 }
   0xf   : > { %p864_p4 = por %p50_p2, %p49_p1  ;;  %s38_s24 = ssub.s32 %s782_s16, %s1061_s20 }
  0x10   : > { %s1042_s23 = scalar_select %p868_p5, 1, 0 }
  0x11   : > { %s1041_s22 = scalar_select %p864_p4, 1, 0 }
  0x12   : > { %p123_p6 = scmp.eq.s32.totalorder %s529_s18, 1  ;;  %p40_p7 = scmp.eq.s32.totalorder %s38_s24, 0 }
  0x13   : > { %p876_p8 = por %p868_p5, %p55_p3  ;;  %p129_p10 = scmp.eq.s32.totalorder %s530_s19, 1 }
  0x14   : > { %p880_p9 = por %p123_p6, %p49_p1  ;;  %p531_p12 = scmp.ge.s32.totalorder %s786_s17, 1 }
  0x15   : > { %s1043_s25 = scalar_select %p876_p8, 1, 0 }
  0x16   : > { %s1044_s26 = scalar_select %p880_p9, 1, 0 }
  0x17   : > { %s885_s27 = scalar_select %p40_p7, %s774_s14, %s42_s21  }
  0x18   : > { %p887_p11 = por %p129_p10, %p55_p3  ;;  %p136_p13 = scmp.lt.s32.totalorder %s786_s17, 3 }
  0x19   : > { %s1047_s1 = sld [smem:[#allocation19_spill]]  ;;  %s160_s8 = sshll.u32 %s1032_s2, 4  ;;  %s161_s8 = int_to_ptr.vmem [resolvable:$true] %s160_s8 }
  0x1a   : > { %s1045_s28 = scalar_select %p887_p11, 1, 0 }
  0x1b   : > { %p893_p0 = pnand %p531_p12, %p136_p13 }
  0x1d   : > { %s1046_s29 = scalar_select %p893_p0, 1, 0 }
  0x1e   : > { %p591_p1 = pneg %p893_p0 }
  0x1f   : > { %s149_s5 = sshll.u32 %s1047_s1, 4  ;;  %s150_s5 = int_to_ptr.vmem [resolvable:$true] %s149_s5 }
  0x20   : > { %p907_p2 = pnand %p591_p1, %p868_p5  ;;  %s694_s10 = scalar_lea.vmem %s150_s5, 16 }
  0x21   : > { %p695_p3 = scmp.ne.s32.totalorder %s150_s5, %s694_s10  ;;  %p702_p12 = scmp.lt.s32.totalorder %s150_s5, %s150_s5 }
  0x22   : > { %p696_p6 = pneg %p907_p2  ;;  %p703_p13 = scmp.lt.s32.totalorder %s694_s10, %s694_s10 }
  0x24   : > { %p697_p7 = pnand %p696_p6, %p695_p3  ;;  %p704_p11 = por %p703_p13, %p702_p12 }
  0x26   : > { %p698_p10 = pneg %p697_p7 }
  0x28   : > { %p705_p9 = pnand %p704_p11, %p698_p10 }
  0x2a   : > { %708 = shalt.err (!%p705_p9)
}
  0x2b   : > { %s788_s11 = smov [#allocation6]   ;;  %s709_s18 = scalar_lea.vmem %s161_s8, 16 }
  0x2c   : > { %594 = dma.vmem_to_smem (!%p907_p2), %s150_s5, 16, %s788_s11, [#allocation5]  }
  0x2d   : > { %p710_p1 = scmp.ne.s32.totalorder %s161_s8, %s709_s18  ;;  %p717_p0 = scmp.lt.s32.totalorder %s161_s8, %s161_s8 }
  0x2e   : > { %p718_p4 = scmp.lt.s32.totalorder %s709_s18, %s709_s18 }
  0x2f   : > { %p712_p5 = pnand %p710_p1, %p696_p6 }
  0x30   : > { %p719_p3 = por %p718_p4, %p717_p0 }
  0x31   : > { %p713_p8 = pneg %p712_p5 }
  0x33   : > { %p720_p7 = pnand %p719_p3, %p713_p8 }
  0x35   : > { %723 = shalt.err (!%p720_p7)
}
  0x36   : > { %s789_s19 = smov [#allocation7]   ;;  %p534_p9 = scmp.ge.s32.totalorder %s786_s17, 2 }
  0x37   : > { %597 = dma.vmem_to_smem (!%p907_p2), %s161_s8, 16, %s789_s19, [#allocation8]  }
  0x38   : > { %167 = sbr.rel (%p534_p9) target bundleno = 79 (0x4f), region = 24 }
  0x3f   : > { %s171_s21 = sand.u32 1, %s774_s14   ;;  %s562_s30 = sshll.u32 %s782_s16, 8 }
  0x40   : > { %s564_s24 = smul.u32 48, %s171_s21  ;;  %s790_s4 = smov 512  }
  0x41   : > { %p1049_p4 = scmp.ne.s32.totalorder %s1041_s22, 0  ;;  %s183_s8 = scalar_lea.hbm %s1030_s0, %s562_s30 }
  0x42   : > { %s175_s10 = scalar_lea.vmem [#allocation2], %s564_s24  ;;  %s791_s18 = smov 256  }
  0x43   : > { %571 = sst [smem:[#allocation11]] (%p1049_p4), %s790_s4  ;;  %s196_s11 = sshll.u32 %s175_s10, 4  ;;  %s197_s11 = int_to_ptr.vmem [resolvable:$true] %s196_s11 }
  0x44   : > { %s570_s5 = scalar_select %p1049_p4, [#allocation0], [#allocation14] }
  0x45   : > { %572 = sst [smem:[#allocation11 + $0x1]] (%p1049_p4), %s791_s18  ;;  %s792_s19 = smov 2  }
  0x46   : > { %s188_s9 = sld [smem:[%s570_s5]]   ;;  %s793_s1 = smov 128  }
  0x47   : > { %573 = sst [smem:[#allocation11 + $0x2]] (%p1049_p4), %s792_s19  ;;  %s794_s4 = smov 8  }
  0x48   : > { %574 = sst [smem:[#allocation11 + $0x3]] (%p1049_p4), %s793_s1  ;;  %s172_s24 = scalar_lea.sflag [#allocation3], %s171_s21 }
  0x49   : > { %575 = sst [smem:[#allocation11 + $0x4]] (%p1049_p4), %s793_s1  ;;  %s795_s6 = smov [#allocation10]  }
  0x4a   : > { %576 = sst [smem:[#allocation11 + $0x5]] (%p1049_p4), %s794_s4 }
  0x4c   : > { %s537_s30 = sshll.u32 %s188_s9, 26 }
  0x4d   : > { %s538_s5 = sadd.s32 134217728, %s537_s30 }
  0x4e   : > { %577 = dma.general (%p1049_p4), %s183_s8, 768, %s197_s11, %s172_s24, %s795_s6, [#allocation11], %s538_s5, 0  }
  0x4f PF: > { %p1050_p5 = scmp.ne.s32.totalorder %s1046_s29, 0 }
  0x50   : > { %s944_s7 = sand.u32 (!%p1050_p5), 1, %s770_s13   ;;  %p1051_p8 = scmp.ne.s32.totalorder (!%p1050_p5), %s1043_s25, 0 }
  0x51   : > { %221 = sbr.rel (%p1050_p5) target bundleno = 160 (0xa0), region = 32  ;;  %s224_s10 = scalar_lea.sflag (!%p1050_p5), [#allocation3], %s944_s7 }
  0x52   : > { %s565_s1 = smul.u32 (!%p1050_p5), 48, %s944_s7 }
  0x54   : > { %s227_s9 = scalar_lea.vmem (!%p1050_p5), [#allocation2], %s565_s1 }
  0x58   : > { %749 = dma.done.wait (%p1051_p8), %s224_s10, 768  }
  0x59   : > { %751 = vsyncadd (%p1051_p8), %s224_s10, 4294966528  ;;  %p1052_p11 = scmp.ne.s32.totalorder %s1042_s23, 0 }
  0x5b   : > { %753 = dma.done.wait (%p1052_p11), [#allocation5], 16  }
  0x5c   : > { %755 = vsyncadd (%p1052_p11), [#allocation5], 4294967280 }
  0x5d   : > { %757 = dma.done.wait (%p1052_p11), [#allocation8], 16  }
  0x5e   : > { %759 = vsyncadd (%p1052_p11), [#allocation8], 4294967280 }
  0x5f   : > { %240 = sfence }
  0x60   : > { %s267_s22 = sld [smem:[#allocation6]]  ;;  %s542_s21 = sld [smem:[#allocation6 + $0x1]]  ;;  %v261_v0 = vld [vmem:[%s227_s9] sm:$0xff]  ;;  %v262_v1 = vld [vmem:[%s227_s9 + $0x8] sm:$0xff]  ;;  %v263_v2 = vld [vmem:[%s227_s9 + $0x10] sm:$0xff] }
  0x61   : > { %s271_s29 = sld [smem:[#allocation7]]  ;;  %s543_s8 = sld [smem:[#allocation6 + $0x2]]  ;;  %v264_v3 = vld [vmem:[%s227_s9 + $0x18] sm:$0xff]  ;;  %v265_v4 = vld [vmem:[%s227_s9 + $0x20] sm:$0xff]  ;;  %v266_v6 = vld [vmem:[%s227_s9 + $0x28] sm:$0xff] }
  0x62   : > { %s962_s11 = sld [smem:[#allocation6 + $0x3]]  ;;  %s964_s25 = sld [smem:[#allocation7 + $0x1]] }
  0x63   : > { %s966_s18 = sld [smem:[#allocation6 + $0x4]]  ;;  %s968_s19 = sld [smem:[#allocation6 + $0x5]] }
  0x64   : > { %s970_s23 = sld [smem:[#allocation6 + $0x6]]  ;;  %s972_s4 = sld [smem:[#allocation7 + $0x2]] }
  0x65   : > { %s974_s30 = sld [smem:[#allocation6 + $0x7]]  ;;  %s976_s5 = sld [smem:[#allocation6 + $0x8]] }
  0x66   : > { %v268_v5 = vstv %s267_s22  ;;  %v276_v9 = vstv %s542_s21  ;;  %s258_s24 = scalar_lea.vmem [#allocation9], %s565_s1  ;;  %s376_s6 = scalar_lea.sflag [#allocation4], %s944_s7 }
  0x67   : > { %v269_v7 = vmul.f32 %v268_v5, %v261_v0  ;;  %v272_v8 = vstv %s271_s29  ;;  %v270_v10 = vmul.f32 %v268_v5, %v262_v1  ;;  %v277_v11 = vmul.f32 %v276_v9, %v263_v2 }
  0x68   : > { %v282_v12 = vstv %s543_s8  ;;  %v278_v13 = vmul.f32 %v276_v9, %v264_v3  ;;  %v288_v14 = vstv %s962_s11  ;;  %v292_v20 = vstv %s964_s25 }
  0x69   : > { %v273_v15 = vadd.f32 %v272_v8, %v269_v7  ;;  %v283_v16 = vmul.f32 %v282_v12, %v265_v4  ;;  %v274_v17 = vadd.f32 %v272_v8, %v270_v10  ;;  %v284_v18 = vmul.f32 %v282_v12, %v266_v6 }
  0x6a   : > { %v289_v19 = vmul.f32 %v288_v14, %v261_v0  ;;  %v296_v21 = vstv %s966_s18  ;;  %v302_v22 = vstv %s968_s19  ;;  %v290_v28 = vmul.f32 %v288_v14, %v262_v1 }
  0x6b   : > { %v279_v23 = vadd.f32 %v277_v11, %v273_v15  ;;  %v280_v24 = vadd.f32 %v278_v13, %v274_v17  ;;  %v297_v25 = vmul.f32 %v296_v21, %v263_v2  ;;  %v303_v26 = vmul.f32 %v302_v22, %v265_v4 }
  0x6c   : > { %v293_v27 = vadd.f32 %v292_v20, %v289_v19  ;;  %v298_v29 = vmul.f32 %v296_v21, %v264_v3  ;;  %v304_v30 = vmul.f32 %v302_v22, %v266_v6  ;;  %v308_v33 = vstv %s970_s23 }
  0x6d   : > { %v285_v31 = vadd.f32 %v283_v16, %v279_v23  ;;  %v286_v32 = vadd.f32 %v284_v18, %v280_v24  ;;  %v312_v34 = vstv %s972_s4  ;;  %v294_v36 = vadd.f32 %v292_v20, %v290_v28 }
  0x6e   : > { %v299_v35 = vadd.f32 %v297_v25, %v293_v27  ;;  %v309_v37 = vmul.f32 %v308_v33, %v261_v0  ;;  %v316_v38 = vstv %s974_s30  ;;  %v322_v42 = vstv %s976_s5 }
  0x6f   : > { %v552_v39 = vmul.f32 -1.442695, %v285_v31  ;;  %v553_v40 = vmul.f32 -1.442695, %v286_v32  ;;  %v317_v41 = vmul.f32 %v316_v38, %v263_v2  ;;  %v300_v44 = vadd.f32 %v298_v29, %v294_v36 }
  0x70   : > { %v305_v43 = vadd.f32 %v303_v26, %v299_v35  ;;  %v313_v45 = vadd.f32 %v312_v34, %v309_v37  ;;  %v323_v46 = vmul.f32 %v322_v42, %v265_v4  ;;  %v310_v47 = vmul.f32 %v308_v33, %v262_v1 }
  0x71   : > { %670 = vpow2.f32 %v552_v39  ;;  %v318_v48 = vmul.f32 %v316_v38, %v264_v3  ;;  %v306_v50 = vadd.f32 %v304_v30, %v300_v44  ;;  %v324_v53 = vmul.f32 %v322_v42, %v266_v6 }
  0x72   : > { %672 = vpow2.f32 %v553_v40  ;;  %v554_v49 = vmul.f32 -1.442695, %v305_v43  ;;  %v319_v51 = vadd.f32 %v317_v41, %v313_v45  ;;  %v314_v52 = vadd.f32 %v312_v34, %v310_v47 }
  0x73   : > { %v555_v54 = vmul.f32 -1.442695, %v306_v50 }
  0x74   : > { %674 = vpow2.f32 %v554_v49  ;;  %v325_v55 = vadd.f32 %v323_v46, %v319_v51  ;;  %v320_v56 = vadd.f32 %v318_v48, %v314_v52 }
  0x75   : > { %676 = vpow2.f32 %v555_v54 }
  0x76   : > { %v556_v57 = vmul.f32 -1.442695, %v325_v55  ;;  %v326_v58 = vadd.f32 %v324_v53, %v320_v56 }
  0x78   : > { %678 = vpow2.f32 %v556_v57  ;;  %v557_v59 = vmul.f32 -1.442695, %v326_v58 }
  0x7a   : > { %680 = vpow2.f32 %v557_v59 }
  0x7b   : > { %v671_v60 = vpop.eup %670 }
  0x7c   : > { %v673_v61 = vpop.eup %672  ;;  %v345_v62 = vadd.f32 1.0, %v671_v60 }
  0x7d   : > { %v346_v63 = vadd.f32 1.0, %v673_v61 }
  0x7e   : > { %v675_v0 = vpop.eup %674  ;;  %682 = vrcp.f32 %v345_v62 }
  0x7f   : > { %684 = vrcp.f32 %v346_v63  ;;  %v347_v1 = vadd.f32 1.0, %v675_v0  ;;  %v677_v2 = vpop.eup %676 }
  0x80   : > { %v348_v3 = vadd.f32 1.0, %v677_v2 }
  0x81   : > { %686 = vrcp.f32 %v347_v1 }
  0x82   : > { %v679_v4 = vpop.eup %678  ;;  %688 = vrcp.f32 %v348_v3 }
  0x83   : > { %v349_v5 = vadd.f32 1.0, %v679_v4 }
  0x84   : > { %v681_v6 = vpop.eup %680 }
  0x85   : > { %690 = vrcp.f32 %v349_v5  ;;  %v350_v7 = vadd.f32 1.0, %v681_v6 }
  0x87   : > { %692 = vrcp.f32 %v350_v7 }
  0x88   : > { %v683_v8 = vpop.eup %682 }
  0x89   : > { %v685_v9 = vpop.eup %684  ;;  %v363_v10 = vmul.f32 %v683_v8, %v285_v31 }
  0x8a   : > { %v364_v11 = vmul.f32 %v685_v9, %v286_v32 }
  0x8b   : > { %v687_v12 = vpop.eup %686  ;;  %369 = vst [vmem:[%s258_s24] sm:$0xff] %v363_v10 }
  0x8c   : > { %370 = vst [vmem:[%s258_s24 + $0x8] sm:$0xff] %v364_v11  ;;  %v365_v13 = vmul.f32 %v687_v12, %v305_v43  ;;  %v689_v14 = vpop.eup %688 }
  0x8d   : > { %v366_v15 = vmul.f32 %v689_v14, %v306_v50 }
  0x8e   : > { %371 = vst [vmem:[%s258_s24 + $0x10] sm:$0xff] %v365_v13 }
  0x8f   : > { %v691_v16 = vpop.eup %690  ;;  %372 = vst [vmem:[%s258_s24 + $0x18] sm:$0xff] %v366_v15 }
  0x90   : > { %v367_v17 = vmul.f32 %v691_v16, %v325_v55 }
  0x91   : > { %v693_v18 = vpop.eup %692 }
  0x92   : > { %373 = vst [vmem:[%s258_s24 + $0x20] sm:$0xff] %v367_v17  ;;  %v368_v19 = vmul.f32 %v693_v18, %v326_v58 }
  0x94   : > { %374 = vst [vmem:[%s258_s24 + $0x28] sm:$0xff] %v368_v19 }
  0x95   : > { %s563_s1 = sshll.u32 %s778_s15, 8  ;;  %s407_s10 = sshll.u32 %s258_s24, 4  ;;  %s408_s10 = int_to_ptr.vmem [resolvable:$true] %s407_s10 }
  0x96   : > { %s390_s29 = scalar_lea.hbm %s1033_s3, %s563_s1  ;;  %s796_s21 = smov 256  }
  0x97   : > { %p1053_p0 = scmp.ne.s32.totalorder %s1044_s26, 0  ;;  %s797_s8 = smov 512  }
  0x98   : > { %s798_s7 = smov 2   ;;  %s799_s11 = smov 128  }
  0x99   : > { %583 = sst [smem:[#allocation13]] (%p1053_p0), %s796_s21  ;;  %s800_s15 = smov 8  }
  0x9a   : > { %584 = sst [smem:[#allocation13 + $0x1]] (%p1053_p0), %s797_s8  ;;  %s801_s25 = smov [#allocation12]  }
  0x9b   : > { %585 = sst [smem:[#allocation13 + $0x2]] (%p1053_p0), %s798_s7  ;;  %s802_s18 = smov 0  }
  0x9c   : > { %586 = sst [smem:[#allocation13 + $0x3]] (%p1053_p0), %s799_s11 }
  0x9d   : > { %587 = sst [smem:[#allocation13 + $0x4]] (%p1053_p0), %s799_s11 }
  0x9e   : > { %588 = sst [smem:[#allocation13 + $0x5]] (%p1053_p0), %s800_s15 }
  0x9f   : > { %589 = dma.general (%p1053_p0), %s408_s10, 768, %s390_s29, %s376_s6, %s801_s25, [#allocation13], %s802_s18, 0  }
  0xa0 PF: > { %s435_s19 = sand.u32 1, %s766_s12   ;;  %p1054_p2 = scmp.ne.s32.totalorder %s1045_s28, 0 }
  0xa1   : > { %s436_s23 = scalar_lea.sflag [#allocation4], %s435_s19 }
  0xa2   : > { %p599_p6 = pnand %p534_p9, %p1054_p2 }
  0xa4   : > { %761 = dma.done.wait (!%p599_p6), %s436_s23, 768  }
  0xa5   : > { %763 = vsyncadd (!%p599_p6), %s436_s23, 4294966528  ;;  %s21_s17 = sadd.s32 1, %s786_s17   ;;  %s1055_s12 = smov %s770_s13 }
  0xa6   : > { %p18_p10 = scmp.ge.s32.totalorder %s21_s17, 4   ;;  %s1056_s13 = smov %s774_s14 }
  0xa7   : > { %s1057_s14 = smov %s885_s27  ;;  %s1058_s15 = smov %s782_s16 }
  0xa8   : > { %s1059_s16 = smov %s1061_s20  ;;  %20 = sbr.rel (!%p18_p10) target bundleno = 10 (0xa), region = 96 }
  0xaf   :  { %441 = vsyncpa [#allocation3], 1 }
  0xb0   :  { %443 = vsyncpa [#allocation3 + $0x1], 1 }
  0xb1   :  { %444 = vsyncpa [#allocation4], 1 }
  0xb2   :  { %446 = vsyncpa [#allocation4 + $0x1], 1 }
  0xb3   :  { %447 = vsyncpa [#allocation5], 1 }
  0xb4   :  { %449 = vsyncpa [#allocation5 + $0x1], 1 }
  0xb5   :  { %450 = vsyncpa [#allocation8], 1 }

</bundles_post_ra>
